<compile_context>
chip_gen: v5e
topology: v5e:2x2
jax: 0.10.0
libtpu: 0.0.40
codegen_flags: <defaults>
</compile_context>

<pallas_src>
import functools
import math

import jax
import jax.numpy as jnp
from jax import lax
from jax.experimental import pallas as pl
from jax.experimental.pallas import tpu as pltpu


def _encoding_kernel(x_ref, cw_ref, c2_ref, s_ref, out_ref, acc_ref, asum_ref, *,
                     n_total, block_n, needs_mask):
    # x_ref:    (1, D, block_n)  N-tile of the current batch element (channel-major)
    # cw_ref:   (K, D)           codewords, native activation dtype (resident)
    # c2_ref:   (K, 1) f32       precomputed ||c_k||^2 (resident)
    # s_ref:    (K, 1) f32       per-codeword scale (resident)
    # out_ref:  (1, 1, K, D)     per-(batch, split) output block (resident over N)
    # acc_ref:  (D, K) f32       VMEM scratch accumulator for sum_n a[k,n]*x[:,n]
    # asum_ref: (K, 1) f32       VMEM scratch accumulator for sum_n a[k,n]
    n_idx = pl.program_id(2)

    @pl.when(n_idx == 0)
    def _():
        acc_ref[...] = jnp.zeros_like(acc_ref)
        asum_ref[...] = jnp.zeros_like(asum_ref)

    x = x_ref[0]                               # (D, tn)  native dtype (no f32 copy)
    c = cw_ref[...]                            # (K, D)   native dtype
    c2 = c2_ref[...]                           # (K, 1)   f32
    s = s_ref[...]                             # (K, 1)   f32

    if needs_mask:
        # Only the globally-last tile can be partial; padded x columns must be
        # zeroed (unspecified OOB data could be NaN/Inf and 0*NaN would poison
        # the MXU contraction even with a == 0 there).
        lane = lax.broadcasted_iota(jnp.int32, (1, block_n), 1)
        g0 = (pl.program_id(1) * pl.num_programs(2) + n_idx) * block_n
        valid = (g0 + lane) < n_total                          # (1, tn)
        x = jnp.where(valid, x, jnp.zeros_like(x))

    # Scaled L2 distances in (K, tn) layout:
    #   SL[k, n] = s_k * (||x_n||^2 - 2 x_n.c_k + ||c_k||^2)
    xf = x.astype(jnp.float32)                                 # upcast only for x^2
    x2 = jnp.sum(xf * xf, axis=0, keepdims=True)               # (1, tn)
    # (K, tn) = c @ x : natural MXU form, big operand streams untransposed.
    xc = lax.dot_general(c, x, (((1,), (0,)), ((), ())),
                         preferred_element_type=jnp.float32)   # (K, tn)
    sl = s * (x2 - 2.0 * xc + c2)                              # (K, tn)

    # Softmax over K (sublane axis), per spatial point; exact divide.
    m = jnp.max(sl, axis=0, keepdims=True)                     # (1, tn)
    p = jnp.exp(sl - m)                                        # (K, tn)
    denom = jnp.sum(p, axis=0, keepdims=True)                  # (1, tn)
    a = p / denom                                              # (K, tn)

    if needs_mask:
        a = jnp.where(valid, a, 0.0)                           # exclude padded points

    # Partial aggregate for this tile:
    #   (D, K) = x @ a^T  -> only the small (K, tn) weights need MXU relayout.
    xa = lax.dot_general(x, a.astype(x.dtype), (((1,), (1,)), ((), ())),
                         preferred_element_type=jnp.float32)   # (D, K)
    acc_ref[...] += xa
    asum_ref[...] += jnp.sum(a, axis=1, keepdims=True)         # (K, 1)

    @pl.when(n_idx == pl.num_programs(2) - 1)
    def _():
        # E[k,d] = sum_n a[k,n]*x[d,n] - (sum_n a[k,n]) * c[k,d]
        cf = c.astype(jnp.float32)                             # (K, D), tiny
        e = acc_ref[...].T - asum_ref[...] * cf                # (K, D)
        out_ref[0, 0] = e.astype(out_ref.dtype)


def _choose_block_n(N, D, K, itemsize):
    """Pick the N-tile width from a VMEM byte budget, preferring divisors of N."""
    # Per lane-column cost: double-buffered native X tile + one f32 elementwise
    # temp (x^2) + a few (K, tn) f32 softmax intermediates.
    per_col = 2 * D * itemsize + 4 * D + 16 * K
    budget = 24 * 1024 * 1024          # conservative across v5e / v6e / v7x
    cap = max(128, (budget // per_col) // 128 * 128)
    if N <= cap:
        return N
    # Prefer the largest 128-multiple that exactly divides N (kills masking).
    for bn in range(cap, 127, -128):
        if N % bn == 0:
            return bn
    return cap


def encoding_forward(x, codewords, scale, *, block_n=None, n_splits=None):
    """x: (B, D, H, W) or (B, D, N); codewords: (K, D); scale: (K,). -> (B, K, D) f32."""
    B, D = x.shape[0], x.shape[1]
    x_bdn = x.reshape(B, D, -1)        # free reshape; no transpose / extra HBM pass
    N = x_bdn.shape[2]
    K = codewords.shape[0]

    # Grid-invariant codeword math hoisted out of the kernel.
    cw = codewords.astype(x.dtype)                                        # MXU operand
    c2 = jnp.sum(codewords.astype(jnp.float32) ** 2, axis=1, keepdims=True)  # (K, 1)
    s = scale.astype(jnp.float32).reshape(K, 1)                           # (K, 1)

    if block_n is None:
        block_n = _choose_block_n(N, D, K, jnp.dtype(x.dtype).itemsize)
    block_n = min(int(block_n), N)
    if block_n < N and block_n % 128 != 0:
        block_n = max(128, (block_n // 128) * 128)
        block_n = min(block_n, N)

    total_steps = pl.cdiv(N, block_n)
    if n_splits is None:
        # On v7x (2 TensorCores) B==1 would leave a core idle; split the N axis.
        n_splits = 2 if (B == 1 and total_steps % 2 == 0) else 1
    n_splits = max(1, math.gcd(int(n_splits), total_steps))
    steps_per = total_steps // n_splits
    needs_mask = (N % block_n) != 0

    kernel = functools.partial(_encoding_kernel, n_total=N, block_n=block_n,
                               needs_mask=needs_mask)

    grid_spec = pltpu.PrefetchScalarGridSpec(
        num_scalar_prefetch=0,
        grid=(B, n_splits, steps_per),
        in_specs=[
            pl.BlockSpec((1, D, block_n),
                         lambda b, p, n: (b, 0, p * steps_per + n)),   # X tile
            pl.BlockSpec((K, D), lambda b, p, n: (0, 0)),              # codewords
            pl.BlockSpec((K, 1), lambda b, p, n: (0, 0)),              # ||c||^2
            pl.BlockSpec((K, 1), lambda b, p, n: (0, 0)),              # scale
        ],
        out_specs=pl.BlockSpec((1, 1, K, D), lambda b, p, n: (b, p, 0, 0)),
        scratch_shapes=[pltpu.VMEM((D, K), jnp.float32),
                        pltpu.VMEM((K, 1), jnp.float32)],
    )

    out = pl.pallas_call(
        kernel,
        out_shape=jax.ShapeDtypeStruct((B, n_splits, K, D), jnp.float32),
        grid_spec=grid_spec,
        compiler_params=pltpu.CompilerParams(
            dimension_semantics=("parallel", "parallel", "arbitrary"),
            vmem_limit_bytes=48 * 1024 * 1024,   # safe on v7x (64 MiB), v5e/v6e (128 MiB)
        ),
    )(x_bdn, cw, c2, s)

    if n_splits > 1:
        return jnp.sum(out, axis=1)      # combine per-split partial aggregates (tiny)
    return out[:, 0]


def encoding_reference(x, codewords, scale):
    """Pure-JAX reference mirroring the PyTorch forward."""
    B, D = x.shape[0], x.shape[1]
    xp = jnp.transpose(x.reshape(B, D, -1), (0, 2, 1)).astype(jnp.float32)
    diff = xp[:, :, None, :] - codewords[None, None, :, :]         # (B, N, K, D)
    sl = scale[None, None, :] * jnp.sum(diff * diff, axis=-1)      # (B, N, K)
    a = jax.nn.softmax(sl, axis=2)                                 # (B, N, K)
    return jnp.einsum("bnk,bnkd->bkd", a, diff)                    # (B, K, D)


if __name__ == "__main__":
    key = jax.random.PRNGKey(0)
    kx, kc, ks, kx1 = jax.random.split(key, 4)

    # Small shapes consistent with the module: D=32 channels, K=8 codewords.
    B, D, H, W, K = 2, 32, 16, 16, 8

    # Deterministic parameter init matching reset_params():
    #   codewords ~ U(-std, std), std = 1/sqrt(K*D);  scale ~ U(-1, 0)
    std = 1.0 / (K * D) ** 0.5
    codewords = jax.random.uniform(kc, (K, D), minval=-std, maxval=std,
                                   dtype=jnp.float32)
    scale = jax.random.uniform(ks, (K,), minval=-1.0, maxval=0.0,
                               dtype=jnp.float32)

    # Case 1: B=2, 16x16 spatial; block_n=128 forces the tiled / accumulate-
    # across-N path (2 N-steps per batch element).
    x = jax.random.normal(kx, (B, D, H, W), dtype=jnp.float32)
    out = jax.block_until_ready(encoding_forward(x, codewords, scale, block_n=128))
    ref = encoding_reference(x, codewords, scale)
    assert out.shape == (B, K, D)
    assert jnp.allclose(out, ref, atol=2e-3, rtol=2e-3), "case 1 mismatch"

    # Case 2: B=1 exercises the N-axis parallel split (2 partial accumulators,
    # both TensorCores busy on v7x), summed in the wrapper.
    x1 = jax.random.normal(kx1, (1, D, H, W), dtype=jnp.float32)
    out1 = jax.block_until_ready(encoding_forward(x1, codewords, scale, block_n=128))
    ref1 = encoding_reference(x1, codewords, scale)
    assert jnp.allclose(out1, ref1, atol=2e-3, rtol=2e-3), "case 2 mismatch"

    # Case 3: non-128-divisible spatial size (15x15=225) exercises the masked
    # partial-last-tile path.
    x3 = jax.random.normal(kx, (B, D, 15, 15), dtype=jnp.float32)
    out3 = jax.block_until_ready(encoding_forward(x3, codewords, scale, block_n=128))
    ref3 = encoding_reference(x3, codewords, scale)
    assert jnp.allclose(out3, ref3, atol=2e-3, rtol=2e-3), "case 3 mismatch"

    print("KERNEL_OK")
</pallas_src>

<mosaic_0001>
module attributes {stable_mosaic.version = 11 : i64} {
  func.func @_encoding_kernel(%arg0: i32, %arg1: i32, %arg2: i32, %arg3: memref<1x32x128xf32, #tpu.memory_space<vmem>>, %arg4: memref<8x32xf32, #tpu.memory_space<vmem>>, %arg5: memref<8x1xf32, #tpu.memory_space<vmem>>, %arg6: memref<8x1xf32, #tpu.memory_space<vmem>>, %arg7: memref<1x1x8x32xf32, #tpu.memory_space<vmem>>, %arg8: memref<32x8xf32, #tpu.memory_space<vmem>>, %arg9: memref<8x1xf32, #tpu.memory_space<vmem>>) attributes {dimension_semantics = [#tpu.dimension_semantics<parallel>, #tpu.dimension_semantics<parallel>, #tpu.dimension_semantics<arbitrary>], iteration_bounds = array<i64: 2, 1, 2>, scalar_prefetch = 0 : i64, scratch_operands = 2 : i64, tpu.core_type = #tpu.core_type<tc>, window_params = [{transform_indices = @transform_0, window_bounds = array<i64: 1, 32, 128>}, {pipeline_mode = #tpu.pipeline_mode<synchronous>, transform_indices = @transform_1, window_bounds = array<i64: 8, 32>}, {pipeline_mode = #tpu.pipeline_mode<synchronous>, transform_indices = @transform_2, window_bounds = array<i64: 8, 1>}, {pipeline_mode = #tpu.pipeline_mode<synchronous>, transform_indices = @transform_3, window_bounds = array<i64: 8, 1>}, {transform_indices = @transform_4, window_bounds = array<i64: 1, 1, 8, 32>}]} {
    %c0_i32 = arith.constant 0 : i32
    %0 = arith.cmpi eq, %arg2, %c0_i32 : i32
    %1 = arith.extui %0 : i1 to i32
    %c0_i32_0 = arith.constant 0 : i32
    %2 = arith.cmpi ne, %1, %c0_i32_0 : i32
    scf.if %2 {
      %cst_24 = arith.constant 0.000000e+00 : f32
      %41 = vector.broadcast %cst_24 : f32 to vector<32x8xf32>
      %c0_25 = arith.constant 0 : index
      %c0_26 = arith.constant 0 : index
      %42 = vector.load %arg8[%c0_25, %c0_26] : memref<32x8xf32, #tpu.memory_space<vmem>>, vector<32x8xf32>
      tpu.vector_store %arg8[%c0_25, %c0_26], %41 {strides = array<i32>} : memref<32x8xf32, #tpu.memory_space<vmem>>, vector<32x8xf32>,
      %cst_27 = arith.constant 0.000000e+00 : f32
      %43 = vector.broadcast %cst_27 : f32 to vector<8x1xf32>
      %c0_28 = arith.constant 0 : index
      %c0_29 = arith.constant 0 : index
      %44 = vector.load %arg9[%c0_28, %c0_29] : memref<8x1xf32, #tpu.memory_space<vmem>>, vector<8x1xf32>
      tpu.vector_store %arg9[%c0_28, %c0_29], %43 {strides = array<i32>} : memref<8x1xf32, #tpu.memory_space<vmem>>, vector<8x1xf32>,
    } else {
    }
    %c0 = arith.constant 0 : index
    %c0_1 = arith.constant 0 : index
    %c0_2 = arith.constant 0 : index
    %3 = vector.load %arg3[%c0, %c0_1, %c0_2] : memref<1x32x128xf32, #tpu.memory_space<vmem>>, vector<1x32x128xf32>
    %4 = vector.shape_cast %3 : vector<1x32x128xf32> to vector<32x128xf32>
    %c0_3 = arith.constant 0 : index
    %c0_4 = arith.constant 0 : index
    %5 = vector.load %arg4[%c0_3, %c0_4] : memref<8x32xf32, #tpu.memory_space<vmem>>, vector<8x32xf32>
    %c0_5 = arith.constant 0 : index
    %c0_6 = arith.constant 0 : index
    %6 = vector.load %arg5[%c0_5, %c0_6] : memref<8x1xf32, #tpu.memory_space<vmem>>, vector<8x1xf32>
    %c0_7 = arith.constant 0 : index
    %c0_8 = arith.constant 0 : index
    %7 = vector.load %arg6[%c0_7, %c0_8] : memref<8x1xf32, #tpu.memory_space<vmem>>, vector<8x1xf32>
    %8 = arith.mulf %4, %4 : vector<32x128xf32>
    %cst = arith.constant dense<0.000000e+00> : vector<128xf32>
    %9 = vector.multi_reduction <add>, %8, %cst [0] : vector<32x128xf32> to vector<128xf32>
    %10 = vector.shape_cast %9 : vector<128xf32> to vector<1x128xf32>
    %cst_9 = arith.constant dense<0.000000e+00> : vector<8x128xf32>
    %11 = tpu.matmul %5, %4, %cst_9 {dimension_numbers = #tpu.dot_dimension_numbers<[1], [0], [0], [1], [0, 0, 1, 1], [], []>} : vector<8x32xf32>, vector<32x128xf32>, vector<8x128xf32> -> vector<8x128xf32>
    %cst_10 = arith.constant 2.000000e+00 : f32
    %12 = vector.broadcast %cst_10 : f32 to vector<8x128xf32>
    %13 = arith.mulf %12, %11 : vector<8x128xf32>
    %14 = vector.broadcast %10 : vector<1x128xf32> to vector<8x128xf32>
    %15 = arith.subf %14, %13 : vector<8x128xf32>
    %16 = vector.broadcast %6 : vector<8x1xf32> to vector<8x128xf32>
    %17 = arith.addf %15, %16 : vector<8x128xf32>
    %18 = vector.broadcast %7 : vector<8x1xf32> to vector<8x128xf32>
    %19 = arith.mulf %18, %17 : vector<8x128xf32>
    %cst_11 = arith.constant dense<0xFF800000> : vector<128xf32>
    %20 = vector.multi_reduction <maximumf>, %19, %cst_11 [0] : vector<8x128xf32> to vector<128xf32>
    %21 = vector.shape_cast %20 : vector<128xf32> to vector<1x128xf32>
    %22 = vector.broadcast %21 : vector<1x128xf32> to vector<8x128xf32>
    %23 = arith.subf %19, %22 : vector<8x128xf32>
    %24 = math.exp %23 : vector<8x128xf32>
    %cst_12 = arith.constant dense<0.000000e+00> : vector<128xf32>
    %25 = vector.multi_reduction <add>, %24, %cst_12 [0] : vector<8x128xf32> to vector<128xf32>
    %26 = vector.shape_cast %25 : vector<128xf32> to vector<1x128xf32>
    %27 = vector.broadcast %26 : vector<1x128xf32> to vector<8x128xf32>
    %28 = arith.divf %24, %27 : vector<8x128xf32>
    %cst_13 = arith.constant dense<0.000000e+00> : vector<32x8xf32>
    %29 = tpu.matmul %4, %28, %cst_13 {dimension_numbers = #tpu.dot_dimension_numbers<[1], [1], [0], [0], [0, 0, 1, 0], [], []>} : vector<32x128xf32>, vector<8x128xf32>, vector<32x8xf32> -> vector<32x8xf32>
    %c0_14 = arith.constant 0 : index
    %c0_15 = arith.constant 0 : index
    %30 = vector.load %arg8[%c0_14, %c0_15] : memref<32x8xf32, #tpu.memory_space<vmem>>, vector<32x8xf32>
    %31 = arith.addf %30, %29 : vector<32x8xf32>
    %c0_16 = arith.constant 0 : index
    %c0_17 = arith.constant 0 : index
    %32 = vector.load %arg8[%c0_16, %c0_17] : memref<32x8xf32, #tpu.memory_space<vmem>>, vector<32x8xf32>
    tpu.vector_store %arg8[%c0_16, %c0_17], %31 {strides = array<i32>} : memref<32x8xf32, #tpu.memory_space<vmem>>, vector<32x8xf32>,
    %c0_18 = arith.constant 0 : index
    %c0_19 = arith.constant 0 : index
    %33 = vector.load %arg9[%c0_18, %c0_19] : memref<8x1xf32, #tpu.memory_space<vmem>>, vector<8x1xf32>
    %cst_20 = arith.constant dense<0.000000e+00> : vector<8xf32>
    %34 = vector.multi_reduction <add>, %28, %cst_20 [1] : vector<8x128xf32> to vector<8xf32>
    %35 = vector.shape_cast %34 : vector<8xf32> to vector<8x1xf32>
    %36 = arith.addf %33, %35 : vector<8x1xf32>
    %c0_21 = arith.constant 0 : index
    %c0_22 = arith.constant 0 : index
    %37 = vector.load %arg9[%c0_21, %c0_22] : memref<8x1xf32, #tpu.memory_space<vmem>>, vector<8x1xf32>
    tpu.vector_store %arg9[%c0_21, %c0_22], %36 {strides = array<i32>} : memref<8x1xf32, #tpu.memory_space<vmem>>, vector<8x1xf32>,
    %c1_i32 = arith.constant 1 : i32
    %38 = arith.cmpi eq, %arg2, %c1_i32 : i32
    %39 = arith.extui %38 : i1 to i32
    %c0_i32_23 = arith.constant 0 : i32
    %40 = arith.cmpi ne, %39, %c0_i32_23 : i32
    scf.if %40 {
      %c0_24 = arith.constant 0 : index
      %c0_25 = arith.constant 0 : index
      %41 = vector.load %arg8[%c0_24, %c0_25] : memref<32x8xf32, #tpu.memory_space<vmem>>, vector<32x8xf32>
      %42 = tpu.transpose %41, [1, 0] : vector<32x8xf32> -> vector<8x32xf32>
      %c0_26 = arith.constant 0 : index
      %c0_27 = arith.constant 0 : index
      %43 = vector.load %arg9[%c0_26, %c0_27] : memref<8x1xf32, #tpu.memory_space<vmem>>, vector<8x1xf32>
      %44 = vector.broadcast %43 : vector<8x1xf32> to vector<8x32xf32>
      %45 = arith.mulf %44, %5 : vector<8x32xf32>
      %46 = arith.subf %42, %45 : vector<8x32xf32>
      %c0_28 = arith.constant 0 : index
      %c0_29 = arith.constant 0 : index
      %c0_30 = arith.constant 0 : index
      %c0_31 = arith.constant 0 : index
      %47 = vector.load %arg7[%c0_28, %c0_29, %c0_30, %c0_31] : memref<1x1x8x32xf32, #tpu.memory_space<vmem>>, vector<1x1x8x32xf32>
      %48 = vector.shape_cast %47 : vector<1x1x8x32xf32> to vector<8x32xf32>
      %49 = vector.shape_cast %46 : vector<8x32xf32> to vector<1x1x8x32xf32>
      tpu.vector_store %arg7[%c0_28, %c0_29, %c0_30, %c0_31], %49 {strides = array<i32>} : memref<1x1x8x32xf32, #tpu.memory_space<vmem>>, vector<1x1x8x32xf32>,
    } else {
    }
    return
  }
  func.func @transform_0(%arg0: i32, %arg1: i32, %arg2: i32) -> (i32, i32, i32) {
    %c2_i32 = arith.constant 2 : i32
    %0 = arith.muli %arg1, %c2_i32 : i32
    %1 = arith.addi %0, %arg2 : i32
    %c0_i32 = arith.constant 0 : i32
    %c0_i32_0 = arith.constant 0 : i32
    return %arg0, %c0_i32, %1 : i32, i32, i32
  }
  func.func @transform_1(%arg0: i32, %arg1: i32, %arg2: i32) -> (i32, i32) {
    %c0_i32 = arith.constant 0 : i32
    %c0_i32_0 = arith.constant 0 : i32
    %c0_i32_1 = arith.constant 0 : i32
    return %c0_i32, %c0_i32_0 : i32, i32
  }
  func.func @transform_2(%arg0: i32, %arg1: i32, %arg2: i32) -> (i32, i32) {
    %c0_i32 = arith.constant 0 : i32
    %c0_i32_0 = arith.constant 0 : i32
    %c0_i32_1 = arith.constant 0 : i32
    return %c0_i32, %c0_i32_0 : i32, i32
  }
  func.func @transform_3(%arg0: i32, %arg1: i32, %arg2: i32) -> (i32, i32) {
    %c0_i32 = arith.constant 0 : i32
    %c0_i32_0 = arith.constant 0 : i32
    %c0_i32_1 = arith.constant 0 : i32
    return %c0_i32, %c0_i32_0 : i32, i32
  }
  func.func @transform_4(%arg0: i32, %arg1: i32, %arg2: i32) -> (i32, i32, i32, i32) {
    %c0_i32 = arith.constant 0 : i32
    %c0_i32_0 = arith.constant 0 : i32
    %c0_i32_1 = arith.constant 0 : i32
    return %arg0, %arg1, %c0_i32, %c0_i32_0 : i32, i32, i32, i32
  }
}

</mosaic_0001>

<bundles_post_ra>
// kernel: tpu_custom_call.1
= control target key start
LH: loop header
LB: loop body
LE: loop exit
PB: predicated region body
PF: predicated region fallthrough
CT: control target
= control target key end

     0   :  { %9 = vsyncpa [#allocation5], 0  ;;  %s1090_s0 = inlined_call_operand.hbm [shape: f32[2,32,256], index: 0, kind: input, shape index: {}]   ;;  %s1091_s1 = inlined_call_operand.vmem [shape: f32[8,32], index: 1, kind: input, shape index: {}]   ;;  %s1092_s2 = inlined_call_operand.vmem [shape: f32[8,1], index: 2, kind: input, shape index: {}]   ;;  %s1093_s3 = inlined_call_operand.vmem [shape: f32[8,1], index: 3, kind: input, shape index: {}]   ;;  %s1094_s4 = inlined_call_operand.hbm [shape: f32[2,1,8,32], index: 4, kind: output, shape index: {}]  }
   0x1   :  { %11 = vsyncpa [#allocation5 + $0x1], 0 }
   0x2   :  { %12 = vsyncpa [#allocation6], 0 }
   0x3   :  { %14 = vsyncpa [#allocation6 + $0x1], 0  ;;  %s872_s15 = smov 0   ;;  %s874_s16 = smov 0  }
   0x4   :  { %s876_s17 = smov 0   ;;  %s878_s18 = smov 0  }
   0x5   :  { %s880_s19 = smov 0   ;;  %s882_s20 = smov 0  }
   0x6   :  { %s884_s21 = smov 0   ;;  %s886_s22 = smov 0  }
   0x7   :  { %s888_s23 = smov 0   ;;  %s890_s24 = smov 0  }
   0x8   :  { %s892_s25 = smov 0  }
   0x9 LB: > { %1100 = sst [smem:[#allocation10_spill]] %s807_s17  ;;  %s552_s26 = sadd.s32 4294967295, %s839_s25   ;;  %s839_s25 = sphi %s892_s25, %s20_s25   ;;  %s835_s24 = sphi %s890_s24, %s1125_s24   ;;  %s831_s23 = sphi %s888_s23, %s1124_s23   ;;  %s827_s22 = sphi %s886_s22, %s1123_s22   ;;  %s823_s21 = sphi %s884_s21, %s1122_s21   ;;  %s819_s20 = sphi %s882_s20, %s1115_s20   ;;  %s815_s19 = sphi %s880_s19, %s1121_s19   ;;  %s811_s18 = sphi %s878_s18, %s1120_s18   ;;  %s807_s17 = sphi %s876_s17, %s1113_s17   ;;  %s803_s16 = sphi %s874_s16, %s1119_s16   ;;  %s799_s15 = sphi %s872_s15, %s1118_s15  }
   0xa   : > { %1101 = sst [smem:[#allocation11_spill]] %s819_s20  ;;  %s553_s27 = sadd.s32 4294967294, %s839_s25  }
   0xb   : > { %s32_s28 = sadd.s32 1, %s831_s23  ;;  %s39_s29 = sadd.s32 1, %s835_s24 }
   0xc   : > { %p33_p0 = scmp.ge.s32.totalorder %s32_s28, 2  ;;  %s52_s30 = sadd.s32 1, %s819_s20 }
   0xd   : > { %p59_p1 = scmp.ne.s32.totalorder %s819_s20, %s815_s19  ;;  %p60_p2 = scmp.eq.s32.totalorder %s839_s25, 0 }
   0xe   : > { %s1127_s28 = smov (%p33_p0, %s32_s28), 0  ;;  %s1129_s29 = smov (!%p33_p0, %s39_s29), %s835_s24 }
   0xf   : > { %1102 = sst [smem:[#allocation12_spill]] %s1127_s28  ;;  %s48_s5 = ssub.s32 %s831_s23, %s1127_s28 }
  0x10   : > { %p938_p3 = por %p60_p2, %p59_p1  ;;  %p41_p4 = scmp.ge.s32.totalorder %s1129_s29, 2 }
  0x11   : > { %p65_p5 = scmp.ne.s32.totalorder %s815_s19, %s811_s18  ;;  %p66_p6 = scmp.eq.s32.totalorder %s552_s26, 0 }
  0x12   : > { %s143_s7 = sadd.s32 1, %s807_s17  ;;  %s1131_s29 = smov (%p41_p4, %s1129_s29), 0 }
  0x13   : > { %1104 = sst [smem:[#allocation13_spill]] %s1131_s29  ;;  %p946_p7 = por %p66_p6, %p65_p5 }
  0x14   : > { %p153_p8 = scmp.ne.s32.totalorder %s807_s17, %s803_s16  ;;  %s47_s9 = ssub.s32 %s835_s24, %s1131_s29 }
  0x15   : > { %p154_p9 = scmp.eq.s32.totalorder %s552_s26, 3  ;;  %s49_s10 = sor.u32 %s48_s5, %s47_s9 }
  0x16   : > { %p141_p10 = scmp.eq.s32.totalorder %s47_s9, 0  ;;  %p50_p11 = scmp.eq.s32.totalorder %s49_s10, 0 }
  0x17   : > { %p954_p12 = por %p154_p9, %p153_p8  ;;  %p159_p13 = scmp.ne.s32.totalorder %s803_s16, %s799_s15 }
  0x18   : > { %s959_s12 = scalar_select %p141_p10, %s807_s17, %s143_s7  }
  0x19   : > { %s962_s13 = scalar_select %p50_p11, %s819_s20, %s52_s30  }
  0x1a   : > { %1107 = sst [smem:[#allocation14_spill]] %s959_s12  ;;  %p160_p0 = scmp.eq.s32.totalorder %s553_s27, 3 }
  0x1b   : > { %1108 = sst [smem:[#allocation15_spill]] %s962_s13  ;;  %p583_p1 = scmp.lt.s32.totalorder %s839_s25, 4 }
  0x1c   : > { %p967_p2 = por %p160_p0, %p159_p13  ;;  %s189_s18 = sand.u32 1, %s819_s20  }
  0x1d   : > { %s556_s26 = sshll.u32 %s189_s18, 5  ;;  %s557_s5 = sshll.u32 %s835_s24, 3 }
  0x1e   : > { %s1109_s14 = scalar_select %p967_p2, 1, 0 }
  0x1f   : > { %s199_s9 = sadd.s32 %s831_s23, %s557_s5  ;;  %s193_s10 = scalar_lea.vmem [#allocation4], %s556_s26 }
  0x20   : > { %1110 = sst [smem:[#allocation16_spill]] %s1109_s14  ;;  %s204_s29 = sshll.u32 %s193_s10, 4  ;;  %s205_s29 = int_to_ptr.vmem [resolvable:$true] %s204_s29 }
  0x21   : > { %s558_s28 = sshll.u32 %s199_s9, 3  ;;  %p576_p4 = pnand %p583_p1, %p938_p3 }
  0x22   : > { %s201_s13 = scalar_lea.hbm %s1090_s0, %s558_s28  ;;  %s190_s12 = scalar_lea.sflag [#allocation5], %s189_s18 }
  0x23   : > { %s202_s27 = sshll.u32 %s201_s13, 4  ;;  %s841_s17 = smov 256   ;;  %s203_s27 = int_to_ptr.hbm [resolvable:$true] %s202_s27 }
  0x24   : > { %s842_s20 = smov 128   ;;  %s843_s14 = smov 8  }
  0x25   : > { %578 = dma.hbm_to_vmem [thread:$0]  (!%p576_p4), %s203_s27, 512, %s205_s29, %s190_s12, %s841_s17, %s842_s20, %s843_s14  }
  0x26   : > { %p559_p5 = scmp.ge.s32.totalorder %s839_s25, 1  ;;  %p212_p6 = scmp.lt.s32.totalorder %s839_s25, 5 }
  0x28   : > { %p213_p8 = pnand %p559_p5, %p212_p6 }
  0x29   : > { %s218_s26 = sand.u32 (!%p213_p8), 1, %s815_s19  }
  0x2a   : > { %216 = sbr.rel (%p213_p8) target bundleno = 588 (0x24c), region = 36  ;;  %s560_s5 = sshll.u32 (!%p213_p8), %s218_s26, 5 }
  0x2b   : > { %s219_s9 = scalar_lea.sflag (!%p213_p8), [#allocation5], %s218_s26  ;;  %s222_s10 = scalar_lea.vmem (!%p213_p8), [#allocation4], %s560_s5 }
  0x2f   : > { %790 = dma.done.wait (%p946_p7), %s219_s9, 512  }
  0x30   : > { %792 = vsyncadd (%p946_p7), %s219_s9, 4294966784  ;;  %s245_s28 = sand.u32 1, %s803_s16   ;;  %p562_p3 = scmp.ne.s32.totalorder %s823_s21, 0 }
  0x31   : > { %s989_s17 = sshll.u32 %s245_s28, 3 }
  0x32   : > { %s247_s20 = scalar_lea.vmem [#allocation7], %s989_s17  ;;  %253 = sbr.rel (%p562_p3) target bundleno = 61 (0x3d), region = 44 }
  0x37   : > { %vm254_vm0 = vcmask 64512   ;;  %v844_v0 = vmov 0.0   ;;  %vm259_vm1 = vcmask 7168  }
  0x38   : > { %255 = vst.msk [vmem:[#allocation2] sm:$0xff] %vm254_vm0, %v844_v0 }
  0x39   : > { %256 = vst.msk [vmem:[#allocation2 + $0x8] sm:$0xff] %vm254_vm0, %v844_v0 }
  0x3a   : > { %257 = vst.msk [vmem:[#allocation2 + $0x10] sm:$0xff] %vm254_vm0, %v844_v0 }
  0x3b   : > { %258 = vst.msk [vmem:[#allocation2 + $0x18] sm:$0xff] %vm254_vm0, %v844_v0 }
  0x3c   : > { %260 = vst.msk [vmem:[#allocation3] sm:$0xff] %vm259_vm1, %v844_v0 }
  0x3d PF: > { %v993_v1 = vld [vmem:[%s222_s10 + $0x18] sm:$0xff]  ;;  %v995_v2 = vld [vmem:[%s222_s10 + $0x10] sm:$0xff]  ;;  %v845_v3 = vmov 0   ;;  %v1001_v5 = vld [vmem:[%s222_s10 + $0x8] sm:$0xff]  ;;  %vm281_vm2 = vcmask 261120   ;;  %vm395_vm7 = vcmask 7168  }
  0x3e   : > { %297 = vmatpush.msra.mxu0 %v993_v1  ;;  %680 = vset.pattern.permute.xlu0 %v845_v3  ;;  %v266_v4 = vld [vmem:[%s1092_s2] sm:$0xff]  ;;  %v1004_v6 = vld [vmem:[%s222_s10] sm:$0xff]  ;;  %v269_v9 = vmul.f32 %v1001_v5, %v1001_v5  ;;  %v270_v11 = vmul.f32 %v995_v2, %v995_v2  ;;  %v271_v13 = vmul.f32 %v993_v1, %v993_v1  ;;  %vm386_vm8 = vcmask 64512   ;;  %p564_p7 = scmp.ne.s32.totalorder %s823_s21, 1 }
  0x3f   : > { %309 = vperm.xlu0 %680, %v266_v4   ;;  %v1010_v7 = vld [vmem:[%s1091_s1] sm:$0xff]  ;;  %v268_v10 = vmul.f32 %v1004_v6, %v1004_v6 }
  0x40   : > { %298 = vmatpush.msra.mxu0 %v995_v2  ;;  %v267_v8 = vld [vmem:[%s1093_s3] sm:$0xff]  ;;  %v379_v61 = vld [vmem:[#allocation2 + $0x8] sm:$0xff] }
  0x41   : > { %v272_v12 = vadd.f32 %v269_v9, %v268_v10  ;;  %v378_v58 = vld [vmem:[#allocation2] sm:$0xff] }
  0x42   : > { %299 = vmatpush.msra.mxu0 %v1001_v5  ;;  %v381_v62 = vld [vmem:[#allocation2 + $0x18] sm:$0xff] }
  0x43   : > { %v273_v14 = vadd.f32 %v272_v12, %v270_v11  ;;  %v391_v55 = vld [vmem:[#allocation3] sm:$0xff] }
  0x44   : > { %300 = vmatpush.msra.mxu0 %v1004_v6 }
  0x45   : > { %563 = vmatmul.msk.f32.vlgmr.msra.gmra.mxu0 %vm281_vm2, %v1010_v7  ;;  %v274_v15 = vadd.f32 %v273_v14, %v271_v13 }
  0x47   : > { %315 = vperm.xlu0 %680, %v267_v8   ;;  %v275_v16 = vrot.slane %v274_v15, 4 }
  0x49   : > { %v276_v17 = vadd.f32 %v275_v16, %v274_v15 }
  0x4b   : > { %v277_v18 = vrot.slane %v276_v17, 2 }
  0x4d   : > { %v278_v19 = vadd.f32 %v277_v18, %v276_v17 }
  0x4f   : > { %v279_v20 = vrot.slane %v278_v19, 1 }
  0x51   : > { %v280_v22 = vadd.f32 %v279_v20, %v278_v19 }
  0xb1   : > { %v310_v21 = vpop.permute.xlu0 %309 }
  0xb9   : > { %v316_v27 = vpop.permute.xlu0 %315 }
  0xc2   : > { %v302_v23 = vpop.f32.mrf.mxu0 }
  0xc3   : > { %v305_v24 = vmul.f32 2.0, %v302_v23 }
  0xc5   : > { %v306_v25 = vsub.f32 %v280_v22, %v305_v24 }
  0xc7   : > { %v312_v26 = vadd.f32 %v310_v21, %v306_v25 }
  0xc9   : > { %v318_v28 = vmul.f32 %v316_v27, %v312_v26 }
  0xcb   : > { %v319_v29 = vrot.slane %v318_v28, 4 }
  0xcd   : > { %v320_v30 = vmax.f32 %v318_v28, %v319_v29 }
  0xcf   : > { %v321_v31 = vrot.slane %v320_v30, 2 }
  0xd1   : > { %v322_v32 = vmax.f32 %v320_v30, %v321_v31 }
  0xd3   : > { %v323_v33 = vrot.slane %v322_v32, 1 }
  0xd5   : > { %v324_v34 = vmax.f32 %v322_v32, %v323_v33 }
  0xd7   : > { %v325_v35 = vsub.f32 %v318_v28, %v324_v34 }
  0xd9   : > { %v326_v36 = vmul.f32 1.442695, %v325_v35 }
  0xdb   : > { %681 = vpow2.f32 %v326_v36 }
  0xe1   : > { %v682_v37 = vpop.eup %681 }
  0xe2   : > { %v328_v38 = vrot.slane %v682_v37, 4 }
  0xe4   : > { %v329_v39 = vadd.f32 %v682_v37, %v328_v38 }
  0xe6   : > { %v330_v40 = vrot.slane %v329_v39, 2 }
  0xe8   : > { %v331_v41 = vadd.f32 %v330_v40, %v329_v39 }
  0xea   : > { %v332_v42 = vrot.slane %v331_v41, 1 }
  0xec   : > { %v333_v43 = vadd.f32 %v332_v42, %v331_v41 }
  0xee   : > { %683 = vrcp.f32 %v333_v43  ;;  %v345_v47 = vand.u32 2147483648, %v333_v43  ;;  %v343_v49 = vand.u32 2147483647, %v333_v43  ;;  %vm339_vm4 = vweird.f32 %v333_v43 }
  0xf0   : > { %v346_v51 = vor.u32 1.1754944e-38, %v345_v47  ;;  %vm344_vm6 = vcmp.eq.f32.partialorder %v343_v49, 8.507059e+37 }
  0xf4   : > { %v684_v44 = vpop.eup %683 }
  0xf5   : > { %v335_v45 = vmul.f32 %v684_v44, %v333_v43  ;;  %vm340_vm3 = vweird.f32 %v684_v44 }
  0xf6   : > { %vm341_vm5 = vmor %vm339_vm4, %vm340_vm3 }
  0xf7   : > { %v336_v46 = vsub.f32 1.0, %v335_v45 }
  0xf9   : > { %v337_v48 = vmul.f32 %v684_v44, %v336_v46 }
  0xfb   : > { %v338_v50 = vadd.f32 %v684_v44, %v337_v48 }
  0xfd   : > { %v342_v52 = vsel %vm341_vm5, %v684_v44, %v338_v50 }
  0xfe   : > { %v347_v53 = vsel %vm344_vm6, %v346_v51, %v342_v52 }
  0xff   : > { %v348_v54 = vmul.f32 %v682_v37, %v347_v53 }
 0x101   : > { %392 = vadd.xlane.f32.xlu1 %v348_v54  ;;  %364 = vmatpush.xpose.msra.mxu1 %v348_v54 }
 0x102   : > { %569 = vmatpush.xpose.msra.mxu2 %v348_v54  ;;  %570 = vmatpush.xpose.msra.mxu3 %v348_v54 }
 0x104   : > { %365 = vmatmul.f32.vlgmr.msra.gmra.mxu1 %v1004_v6 }
 0x105   : > { %368 = vmatmul.f32.vlgmr.msra.gmra.mxu2 %v1001_v5  ;;  %374 = vmatmul.f32.vlgmr.msra.gmra.mxu3 %v993_v1  ;;  %v380_v1 = vld [vmem:[#allocation2 + $0x10] sm:$0xff] }
 0x10d   : > { %371 = vmatmul.f32.gmra.mxu2 %v995_v2 }
 0x174   : > { %v393_v56 = vpop.xlane.xlu1 %392 }
 0x175   : > { %v394_v57 = vadd.f32 %v393_v56, %v391_v55 }
 0x177   : > { %396 = vst.msk [vmem:[#allocation3] sm:$0xff] %vm395_vm7, %v394_v57 }
 0x181   : > { %v366_v59 = vpop.f32.mrf.mxu1 }
 0x182   : > { %v382_v60 = vadd.f32 %v378_v58, %v366_v59 }
 0x184   : > { %387 = vst.msk [vmem:[#allocation2] sm:$0xff] %vm386_vm8, %v382_v60 }
 0x188   : > { %v369_v63 = vpop.f32.mrf.mxu2  ;;  %v375_v0 = vpop.f32.mrf.mxu3 }
 0x189   : > { %v383_v3 = vadd.f32 %v379_v61, %v369_v63  ;;  %v385_v4 = vadd.f32 %v381_v62, %v375_v0 }
 0x18b   : > { %388 = vst.msk [vmem:[#allocation2 + $0x8] sm:$0xff] %vm386_vm8, %v383_v3 }
 0x18c   : > { %390 = vst.msk [vmem:[#allocation2 + $0x18] sm:$0xff] %vm386_vm8, %v385_v4 }
 0x18f   : > { %400 = sbr.rel (%p564_p7) target bundleno = 573 (0x23d), region = 48 }
 0x190   : > { %v372_v2 = vpop.f32.mrf.mxu2 }
 0x191   : > { %v384_v5 = vadd.f32 %v380_v1, %v372_v2 }
 0x193   : > { %389 = vst.msk [vmem:[#allocation2 + $0x10] sm:$0xff] %vm386_vm8, %v384_v5 }
 0x194   : > { %v401_v6 = vld [vmem:[#allocation2] sm:$0xff]  ;;  %v846_v8 = vmov 0   ;;  %v402_v10 = vld [vmem:[#allocation2 + $0x8] sm:$0xff]  ;;  %v404_v12 = vld [vmem:[#allocation2 + $0x18] sm:$0xff] }
 0x195   : > { %405 = vxpose.xlu0.b32.start [1/4] (short) (narrow) %v401_v6, 8  ;;  %685 = vset.pattern.permute.xlu1 %v846_v8  ;;  %v437_v9 = vld [vmem:[#allocation3] sm:$0xff] }
 0x196   : > { %440 = vperm.xlu1 %685, %v437_v9  }
 0x19a   : > { %v403_v11 = vld [vmem:[#allocation2 + $0x10] sm:$0xff] }
 0x19d   : > { %406 = vxpose.xlu0.b32.cont [2/4] (short) (narrow) %v402_v10, 8 }
 0x1a5   : > { %407 = vxpose.xlu0.b32.cont [3/4] (short) (narrow) %v403_v11, 8 }
 0x1ad   : > { %408 = vxpose.xlu0.b32.end [4/4] (short) (narrow) %v404_v12, 8 }
 0x208   : > { %v441_v13 = vpop.permute.xlu1 %440 }
 0x209   : > { %v443_v14 = vmul.f32 %v441_v13, %v1010_v7 }
 0x214   : > { %686 = vset.pattern.permute.xlu0 %v846_v8 }
 0x239   : > { %v421_v15 = vpop.trf.xlu0 }
 0x23a   : > { %v444_v16 = vsub.f32 %v421_v15, %v443_v14 }
 0x23c   : > { %445 = vst.msk [vmem:[%s247_s20] sm:$0xff] %vm281_vm2, %v444_v16 }
 0x23d PF: > { %s566_s21 = sshll.u32 %s827_s22, 3  ;;  %s460_s27 = sshll.u32 %s247_s20, 4  ;;  %s461_s27 = int_to_ptr.vmem [resolvable:$true] %s460_s27 }
 0x23e   : > { %s458_s30 = scalar_lea.hbm %s1094_s4, %s566_s21  ;;  %s447_s5 = scalar_lea.sflag [#allocation6], %s245_s28 }
 0x23f   : > { %s462_s26 = sshll.u32 %s458_s30, 4  ;;  %s737_s6 = scalar_lea.hbm %s1094_s4, 16  ;;  %s463_s26 = int_to_ptr.hbm [resolvable:$true] %s462_s26 }
 0x240   : > { %s731_s9 = sshra.s32 %s463_s26, 4  ;;  %s732_s9 = int_to_ptr.hbm [resolvable:$true] %s731_s9 }
 0x241   : > { %s733_s10 = scalar_lea.hbm %s732_s9, 8  ;;  %p738_p13 = scmp.lt.s32.totalorder %s732_s9, %s1094_s4 }
 0x242   : > { %p734_p9 = scmp.ne.s32.totalorder %s732_s9, %s733_s10  ;;  %p739_p0 = scmp.lt.s32.totalorder %s737_s6, %s733_s10 }
 0x244   : > { %p735_p10 = pnand %p734_p9, %p954_p12  ;;  %p740_p1 = por %p739_p0, %p738_p13 }
 0x246   : > { %p736_p11 = pneg %p735_p10 }
 0x248   : > { %p741_p4 = pnand %p740_p1, %p736_p11 }
 0x24a   : > { %744 = shalt.err (!%p741_p4)
}
 0x24b   : > { %573 = dma.vmem_to_hbm [thread:$0]  (%p954_p12), %s461_s27, 128, %s463_s26, %s447_s5  }
 0x24c PF: > { %p584_p5 = scmp.ge.s32.totalorder %s839_s25, 2  ;;  %s474_s17 = sand.u32 1, %s799_s15  }
 0x24d   : > { %s475_s20 = scalar_lea.sflag [#allocation6], %s474_s17 }
 0x24e   : > { %p580_p6 = pnand %p584_p5, %p967_p2 }
 0x250   : > { %p581_p8 = pneg %p580_p6 }
 0x252   : > { %794 = dma.done.wait (%p581_p8), %s475_s20, 128  }
 0x253   : > { %796 = vsyncadd (%p581_p8), %s475_s20, 4294967168  ;;  %s20_s25 = sadd.s32 1, %s839_s25   ;;  %s1112_s13 = sld [smem:[#allocation10_spill]] }
 0x254   : > { %p17_p3 = scmp.ge.s32.totalorder %s20_s25, 6   ;;  %s1113_s17 = sld [smem:[#allocation14_spill]] }
 0x255   : > { %s1114_s11 = sld [smem:[#allocation11_spill]]  ;;  %s1118_s15 = smov %s803_s16 }
 0x256   : > { %s1115_s20 = sld [smem:[#allocation15_spill]]  ;;  %s1120_s18 = smov %s815_s19 }
 0x257   : > { %s1116_s14 = sld [smem:[#allocation12_spill]]  ;;  %s1122_s21 = smov %s831_s23 }
 0x258   : > { %s1117_s7 = sld [smem:[#allocation13_spill]]  ;;  %s1123_s22 = smov %s835_s24 }
 0x259   : > { %s1119_s16 = smov %s1112_s13 }
 0x25a   :  { %19 = sbr.rel (!%p17_p3) target bundleno = 9 (0x9), region = 89 }
 0x25b   : > { %s1121_s19 = smov %s1114_s11 }
 0x25d   : > { %s1124_s23 = smov %s1116_s14 }
 0x25e   : > { %s1125_s24 = smov %s1117_s7 }
 0x25f   :  { %481 = vsyncpa [#allocation5], 1 }
 0x260   :  { %483 = vsyncpa [#allocation5 + $0x1], 1 }
 0x261   :  { %484 = vsyncpa [#allocation6], 1 }
 0x262   :  { %486 = vsyncpa [#allocation6 + $0x1], 1 }

</bundles_post_ra>
